<compile_context>
chip_gen: v6e
topology: v6e:2x2x1
jax: 0.10.0
libtpu: 0.0.40
codegen_flags: <defaults>
</compile_context>

<pallas_src>
import functools

import jax
import jax.numpy as jnp
from jax.experimental import pallas as pl
from jax.experimental.pallas import tpu as pltpu


def _embedding_gather_kernel(ids_ref, pids_ref,       # scalar-prefetch (SMEM)
                             word_hbm, pos_hbm,       # tables, left in HBM
                             o_ref,                   # (T, H) output block
                             w_buf, p_buf, sems,      # scratch (double-buffered)
                             *, rows_per_tile, n_seq):
    outer = pl.program_id(0)          # "parallel" chunk (megacore-shardable)
    inner = pl.program_id(1)          # "arbitrary" (sequential) tile in chunk

    def issue(tile, slot):
        base = tile * rows_per_tile

        @pl.loop(0, rows_per_tile)
        def _issue(r):
            wid = ids_ref[base + r]
            pid = pids_ref[base + r]
            pltpu.make_async_copy(word_hbm.at[wid], w_buf.at[slot, r],
                                  sems.at[0, slot]).start()
            pltpu.make_async_copy(pos_hbm.at[pid], p_buf.at[slot, r],
                                  sems.at[1, slot]).start()

    tile = outer * n_seq + inner
    slot = inner % 2

    # Prime this chunk's pipeline on its first sequential step.
    @pl.when(inner == 0)
    def _():
        issue(tile, 0)

    # Prefetch the next tile (same chunk) into the other slot so its row DMAs
    # run concurrently with this tile's drain, add and output store.
    @pl.when(inner + 1 < n_seq)
    def _():
        issue(tile + 1, 1 - slot)

    # Drain the current slot: every issued copy has identical size, so
    # rows_per_tile equal-size waits on the shared per-slot semaphore complete
    # only once all row DMAs of this slot have landed.
    @pl.loop(0, rows_per_tile)
    def _drain(r):
        pltpu.make_async_copy(word_hbm.at[0], w_buf.at[slot, 0],
                              sems.at[0, slot]).wait()
        pltpu.make_async_copy(pos_hbm.at[0], p_buf.at[slot, 0],
                              sems.at[1, slot]).wait()

    # Dense (T, H) add + store; the cast handles fp32_residual_connection.
    o_ref[...] = (w_buf[slot] + p_buf[slot]).astype(o_ref.dtype)


def _pick_rows_per_tile(n_rows, hidden, itemsize):
    """Largest divisor of n_rows that is a multiple of 8 and keeps each per-slot
    gather buffer <= ~1 MiB (4 gather slots + double-buffered output stay under
    the default scoped-VMEM limit on all generations). Falls back to a
    full-array block, which is always layout-legal."""
    cap = max(8, (1 * 1024 * 1024) // max(1, hidden * itemsize))
    cap = min(cap, 512, n_rows)
    for r in range(cap, 7, -1):
        if n_rows % r == 0 and r % 8 == 0:
            return r
    return n_rows


def gpt_moe_embedding(
    input_ids,          # [B, S] int32
    position_ids,       # [B, S] int32
    word_emb,           # [V, H]
    pos_emb,            # [P, H]
    *,
    hidden_dropout=0.0,
    fp32_residual_connection=False,
):
    # Dropout is identity for p == 0 / eval mode (what we model here).
    # TODO(synk): training-mode dropout (pltpu.prng_*), sequence-parallel scatter
    #             + forked RNG, and the vocab-parallel all-reduce of
    #             VocabParallelEmbedding are not modeled.
    assert hidden_dropout == 0.0

    B, S = input_ids.shape
    V, H = word_emb.shape
    n_rows = B * S

    # Flatten indices in [S, B] (Megatron output) order: output row r = s*B + b.
    ids_sb = input_ids.T.reshape(-1).astype(jnp.int32)
    pids_sb = position_ids.T.reshape(-1).astype(jnp.int32)

    out_dtype = jnp.float32 if fp32_residual_connection else word_emb.dtype
    in_bytes = jnp.dtype(word_emb.dtype).itemsize
    out_bytes = jnp.dtype(out_dtype).itemsize

    rows_per_tile = _pick_rows_per_tile(n_rows, H, max(in_bytes, out_bytes))
    n_tiles = n_rows // rows_per_tile
    # At most 2 TensorCores share a chip (v7x megacore); one chunk per core.
    n_par = 2 if (n_tiles % 2 == 0 and n_tiles >= 2) else 1
    n_seq = n_tiles // n_par

    kernel = functools.partial(_embedding_gather_kernel,
                               rows_per_tile=rows_per_tile, n_seq=n_seq)

    cost = pl.CostEstimate(
        flops=n_rows * H,
        transcendentals=0,
        bytes_accessed=int(n_rows * H * (2 * in_bytes + out_bytes)
                           + 2 * n_rows * 4),
    )

    out_flat = pl.pallas_call(
        kernel,
        grid_spec=pltpu.PrefetchScalarGridSpec(
            num_scalar_prefetch=2,
            grid=(n_par, n_seq),
            in_specs=[
                pl.BlockSpec(memory_space=pl.ANY),   # word table stays in HBM
                pl.BlockSpec(memory_space=pl.ANY),   # position table stays in HBM
            ],
            out_specs=pl.BlockSpec(
                (rows_per_tile, H),
                lambda o, i, ids, pids: (o * n_seq + i, 0)),
            scratch_shapes=[
                pltpu.VMEM((2, rows_per_tile, H), word_emb.dtype),
                pltpu.VMEM((2, rows_per_tile, H), pos_emb.dtype),
                pltpu.SemaphoreType.DMA((2, 2)),     # [table, slot]
            ],
        ),
        out_shape=jax.ShapeDtypeStruct((n_rows, H), out_dtype),
        compiler_params=pltpu.CompilerParams(
            dimension_semantics=("parallel", "arbitrary")),
        cost_estimate=cost,
    )(ids_sb, pids_sb, word_emb, pos_emb)

    # Rows were produced in s-major order -> pure reshape, no HBM transpose pass.
    return out_flat.reshape(S, B, H)


def _reference(input_ids, position_ids, word_emb, pos_emb,
               fp32_residual_connection=False):
    emb = (word_emb[input_ids] + pos_emb[position_ids]).transpose(1, 0, 2)
    if fp32_residual_connection:
        emb = emb.astype(jnp.float32)
    return emb


if __name__ == "__main__":
    key = jax.random.PRNGKey(0)

    # ---- Test 1: small fp32 config (single tile). -------------------------
    B, S, H, V, P = 2, 8, 128, 512, 64
    k_w, k_p, k_ids, key = jax.random.split(key, 4)
    word_emb = (0.02 * jax.random.normal(k_w, (V, H))).astype(jnp.float32)
    pos_emb = (0.02 * jax.random.normal(k_p, (P, H))).astype(jnp.float32)
    input_ids = jax.random.randint(k_ids, (B, S), 0, V, dtype=jnp.int32)
    position_ids = jnp.broadcast_to(jnp.arange(S, dtype=jnp.int32), (B, S))

    out = jax.block_until_ready(
        gpt_moe_embedding(input_ids, position_ids, word_emb, pos_emb))
    ref = _reference(input_ids, position_ids, word_emb, pos_emb)
    assert out.shape == (S, B, H), out.shape
    assert jnp.allclose(out, ref, atol=1e-6), "mismatch vs reference (test 1)"

    # ---- Test 2: bf16 tables + fp32 residual, multi-tile so the ------------
    # ---- double-buffered prefetch path and megacore split are exercised. ---
    B2, S2, H2, V2, P2 = 2, 512, 128, 1024, 512
    k_w2, k_p2, k_ids2, key = jax.random.split(key, 4)
    word_emb2 = (0.02 * jax.random.normal(k_w2, (V2, H2))).astype(jnp.bfloat16)
    pos_emb2 = (0.02 * jax.random.normal(k_p2, (P2, H2))).astype(jnp.bfloat16)
    input_ids2 = jax.random.randint(k_ids2, (B2, S2), 0, V2, dtype=jnp.int32)
    position_ids2 = jnp.broadcast_to(jnp.arange(S2, dtype=jnp.int32), (B2, S2))

    out2 = jax.block_until_ready(
        gpt_moe_embedding(input_ids2, position_ids2, word_emb2, pos_emb2,
                          fp32_residual_connection=True))
    ref2 = _reference(input_ids2, position_ids2, word_emb2, pos_emb2,
                      fp32_residual_connection=True)
    assert out2.shape == (S2, B2, H2), out2.shape
    assert out2.dtype == jnp.float32, out2.dtype
    assert jnp.allclose(out2, ref2, atol=1e-2), "mismatch vs reference (test 2)"

    print("KERNEL_OK")
</pallas_src>

<mosaic_0001>
module attributes {stable_mosaic.version = 11 : i64} {
  func.func @_embedding_gather_kernel(%arg0: i32, %arg1: i32, %arg2: memref<16xi32, #tpu.memory_space<smem>>, %arg3: memref<16xi32, #tpu.memory_space<smem>>, %arg4: memref<512x128xf32, #tpu.memory_space<any>>, %arg5: memref<64x128xf32, #tpu.memory_space<any>>, %arg6: memref<16x128xf32, #tpu.memory_space<vmem>>, %arg7: memref<2x16x128xf32, #tpu.memory_space<vmem>>, %arg8: memref<2x16x128xf32, #tpu.memory_space<vmem>>, %arg9: memref<2x2x!tpu.dma_semaphore, #tpu.memory_space<semaphore_mem>>) attributes {dimension_semantics = [#tpu.dimension_semantics<parallel>, #tpu.dimension_semantics<arbitrary>], iteration_bounds = array<i64: 1, 1>, scalar_prefetch = 2 : i64, scratch_operands = 3 : i64, tpu.core_type = #tpu.core_type<tc>, window_params = [{}, {}, {transform_indices = @transform_2, window_bounds = array<i64: 16, 128>}]} {
    %c1_i32 = arith.constant 1 : i32
    %0 = arith.muli %arg0, %c1_i32 : i32
    %1 = arith.addi %0, %arg1 : i32
    %c2_i32 = arith.constant 2 : i32
    %c0_i32 = arith.constant 0 : i32
    %2 = arith.cmpi eq, %c2_i32, %c0_i32 : i32
    %c1_i32_0 = arith.constant 1 : i32
    %3 = arith.select %2, %c1_i32_0, %c2_i32 : i32
    %4 = arith.remsi %arg1, %3 : i32
    %c0_i32_1 = arith.constant 0 : i32
    %5 = arith.cmpi ne, %4, %c0_i32_1 : i32
    %c0_i32_2 = arith.constant 0 : i32
    %6 = arith.cmpi slt, %4, %c0_i32_2 : i32
    %c0_i32_3 = arith.constant 0 : i32
    %7 = arith.cmpi slt, %3, %c0_i32_3 : i32
    %8 = arith.xori %6, %7 : i1
    %9 = arith.andi %8, %5 : i1
    %10 = arith.addi %4, %3 : i32
    %11 = arith.select %9, %10, %4 : i32
    %c0_i32_4 = arith.constant 0 : i32
    %12 = arith.cmpi eq, %arg1, %c0_i32_4 : i32
    %13 = arith.extui %12 : i1 to i32
    %c0_i32_5 = arith.constant 0 : i32
    %14 = arith.cmpi ne, %13, %c0_i32_5 : i32
    scf.if %14 {
      %c16_i32_16 = arith.constant 16 : i32
      %28 = arith.muli %1, %c16_i32_16 : i32
      %c0_i32_17 = arith.constant 0 : i32
      %c16_i32_18 = arith.constant 16 : i32
      %29 = arith.addi %c0_i32_17, %c16_i32_18 : i32
      %c1_i32_19 = arith.constant 1 : i32
      scf.for %arg10 = %c0_i32_17 to %29 step %c1_i32_19  : i32 {
        %c1_i32_21 = arith.constant 1 : i32
        %30 = arith.muli %arg10, %c1_i32_21 : i32
        %c0_i32_22 = arith.constant 0 : i32
        %31 = arith.addi %c0_i32_22, %30 : i32
        %32 = arith.addi %28, %31 : i32
        %33 = arith.index_cast %32 : i32 to index
        %34 = memref.load %arg2[%33] : memref<16xi32, #tpu.memory_space<smem>>
        %35 = arith.addi %28, %31 : i32
        %36 = arith.index_cast %35 : i32 to index
        %37 = memref.load %arg3[%36] : memref<16xi32, #tpu.memory_space<smem>>
        %c0_i32_23 = arith.constant 0 : i32
        %c0_i32_24 = arith.constant 0 : i32
        %c0_i32_25 = arith.constant 0 : i32
        %c0_i32_26 = arith.constant 0 : i32
        %38 = tpu.memref_slice %arg4[%34, %c0_i32_26] : memref<512x128xf32, #tpu.memory_space<any>> -> memref<1x128xf32, #tpu.memory_space<any>>
        %39 = tpu.memref_squeeze %38 : memref<1x128xf32, #tpu.memory_space<any>> -> memref<128xf32, #tpu.memory_space<any>>
        %c0_i32_27 = arith.constant 0 : i32
        %40 = tpu.memref_slice %arg7[%c0_i32_23, %31, %c0_i32_27] : memref<2x16x128xf32, #tpu.memory_space<vmem>> -> memref<1x1x128xf32, #tpu.memory_space<vmem>>
        %41 = tpu.memref_squeeze %40 : memref<1x1x128xf32, #tpu.memory_space<vmem>> -> memref<128xf32, #tpu.memory_space<vmem>>
        %42 = tpu.memref_slice %arg9[%c0_i32_24, %c0_i32_25] : memref<2x2x!tpu.dma_semaphore, #tpu.memory_space<semaphore_mem>> -> memref<1x1x!tpu.dma_semaphore, #tpu.memory_space<semaphore_mem>>
        %43 = tpu.memref_squeeze %42 : memref<1x1x!tpu.dma_semaphore, #tpu.memory_space<semaphore_mem>> -> memref<!tpu.dma_semaphore, #tpu.memory_space<semaphore_mem>>
        tpu.enqueue_dma source(%39 : memref<128xf32, #tpu.memory_space<any>>) target(%41 : memref<128xf32, #tpu.memory_space<vmem>>) target_semaphore(%43 : memref<!tpu.dma_semaphore, #tpu.memory_space<semaphore_mem>>)
        %c0_i32_28 = arith.constant 0 : i32
        %c1_i32_29 = arith.constant 1 : i32
        %c0_i32_30 = arith.constant 0 : i32
        %c0_i32_31 = arith.constant 0 : i32
        %44 = tpu.memref_slice %arg5[%37, %c0_i32_31] : memref<64x128xf32, #tpu.memory_space<any>> -> memref<1x128xf32, #tpu.memory_space<any>>
        %45 = tpu.memref_squeeze %44 : memref<1x128xf32, #tpu.memory_space<any>> -> memref<128xf32, #tpu.memory_space<any>>
        %c0_i32_32 = arith.constant 0 : i32
        %46 = tpu.memref_slice %arg8[%c0_i32_28, %31, %c0_i32_32] : memref<2x16x128xf32, #tpu.memory_space<vmem>> -> memref<1x1x128xf32, #tpu.memory_space<vmem>>
        %47 = tpu.memref_squeeze %46 : memref<1x1x128xf32, #tpu.memory_space<vmem>> -> memref<128xf32, #tpu.memory_space<vmem>>
        %48 = tpu.memref_slice %arg9[%c1_i32_29, %c0_i32_30] : memref<2x2x!tpu.dma_semaphore, #tpu.memory_space<semaphore_mem>> -> memref<1x1x!tpu.dma_semaphore, #tpu.memory_space<semaphore_mem>>
        %49 = tpu.memref_squeeze %48 : memref<1x1x!tpu.dma_semaphore, #tpu.memory_space<semaphore_mem>> -> memref<!tpu.dma_semaphore, #tpu.memory_space<semaphore_mem>>
        tpu.enqueue_dma source(%45 : memref<128xf32, #tpu.memory_space<any>>) target(%47 : memref<128xf32, #tpu.memory_space<vmem>>) target_semaphore(%49 : memref<!tpu.dma_semaphore, #tpu.memory_space<semaphore_mem>>)
      }
      %c16_i32_20 = arith.constant 16 : i32
    } else {
    }
    %c1_i32_6 = arith.constant 1 : i32
    %15 = arith.addi %arg1, %c1_i32_6 : i32
    %c1_i32_7 = arith.constant 1 : i32
    %16 = arith.cmpi slt, %15, %c1_i32_7 : i32
    %17 = arith.extui %16 : i1 to i32
    %c0_i32_8 = arith.constant 0 : i32
    %18 = arith.cmpi ne, %17, %c0_i32_8 : i32
    scf.if %18 {
      %c1_i32_16 = arith.constant 1 : i32
      %28 = arith.addi %1, %c1_i32_16 : i32
      %c1_i32_17 = arith.constant 1 : i32
      %29 = arith.subi %c1_i32_17, %11 : i32
      %c16_i32_18 = arith.constant 16 : i32
      %30 = arith.muli %28, %c16_i32_18 : i32
      %c0_i32_19 = arith.constant 0 : i32
      %c16_i32_20 = arith.constant 16 : i32
      %31 = arith.addi %c0_i32_19, %c16_i32_20 : i32
      %c1_i32_21 = arith.constant 1 : i32
      scf.for %arg10 = %c0_i32_19 to %31 step %c1_i32_21  : i32 {
        %c1_i32_23 = arith.constant 1 : i32
        %32 = arith.muli %arg10, %c1_i32_23 : i32
        %c0_i32_24 = arith.constant 0 : i32
        %33 = arith.addi %c0_i32_24, %32 : i32
        %34 = arith.addi %30, %33 : i32
        %35 = arith.index_cast %34 : i32 to index
        %36 = memref.load %arg2[%35] : memref<16xi32, #tpu.memory_space<smem>>
        %37 = arith.addi %30, %33 : i32
        %38 = arith.index_cast %37 : i32 to index
        %39 = memref.load %arg3[%38] : memref<16xi32, #tpu.memory_space<smem>>
        %c0_i32_25 = arith.constant 0 : i32
        %c0_i32_26 = arith.constant 0 : i32
        %40 = tpu.memref_slice %arg4[%36, %c0_i32_26] : memref<512x128xf32, #tpu.memory_space<any>> -> memref<1x128xf32, #tpu.memory_space<any>>
        %41 = tpu.memref_squeeze %40 : memref<1x128xf32, #tpu.memory_space<any>> -> memref<128xf32, #tpu.memory_space<any>>
        %c0_i32_27 = arith.constant 0 : i32
        %42 = tpu.memref_slice %arg7[%29, %33, %c0_i32_27] : memref<2x16x128xf32, #tpu.memory_space<vmem>> -> memref<1x1x128xf32, #tpu.memory_space<vmem>>
        %43 = tpu.memref_squeeze %42 : memref<1x1x128xf32, #tpu.memory_space<vmem>> -> memref<128xf32, #tpu.memory_space<vmem>>
        %44 = tpu.memref_slice %arg9[%c0_i32_25, %29] : memref<2x2x!tpu.dma_semaphore, #tpu.memory_space<semaphore_mem>> -> memref<1x1x!tpu.dma_semaphore, #tpu.memory_space<semaphore_mem>>
        %45 = tpu.memref_squeeze %44 : memref<1x1x!tpu.dma_semaphore, #tpu.memory_space<semaphore_mem>> -> memref<!tpu.dma_semaphore, #tpu.memory_space<semaphore_mem>>
        tpu.enqueue_dma source(%41 : memref<128xf32, #tpu.memory_space<any>>) target(%43 : memref<128xf32, #tpu.memory_space<vmem>>) target_semaphore(%45 : memref<!tpu.dma_semaphore, #tpu.memory_space<semaphore_mem>>)
        %c1_i32_28 = arith.constant 1 : i32
        %c0_i32_29 = arith.constant 0 : i32
        %46 = tpu.memref_slice %arg5[%39, %c0_i32_29] : memref<64x128xf32, #tpu.memory_space<any>> -> memref<1x128xf32, #tpu.memory_space<any>>
        %47 = tpu.memref_squeeze %46 : memref<1x128xf32, #tpu.memory_space<any>> -> memref<128xf32, #tpu.memory_space<any>>
        %c0_i32_30 = arith.constant 0 : i32
        %48 = tpu.memref_slice %arg8[%29, %33, %c0_i32_30] : memref<2x16x128xf32, #tpu.memory_space<vmem>> -> memref<1x1x128xf32, #tpu.memory_space<vmem>>
        %49 = tpu.memref_squeeze %48 : memref<1x1x128xf32, #tpu.memory_space<vmem>> -> memref<128xf32, #tpu.memory_space<vmem>>
        %50 = tpu.memref_slice %arg9[%c1_i32_28, %29] : memref<2x2x!tpu.dma_semaphore, #tpu.memory_space<semaphore_mem>> -> memref<1x1x!tpu.dma_semaphore, #tpu.memory_space<semaphore_mem>>
        %51 = tpu.memref_squeeze %50 : memref<1x1x!tpu.dma_semaphore, #tpu.memory_space<semaphore_mem>> -> memref<!tpu.dma_semaphore, #tpu.memory_space<semaphore_mem>>
        tpu.enqueue_dma source(%47 : memref<128xf32, #tpu.memory_space<any>>) target(%49 : memref<128xf32, #tpu.memory_space<vmem>>) target_semaphore(%51 : memref<!tpu.dma_semaphore, #tpu.memory_space<semaphore_mem>>)
      }
      %c16_i32_22 = arith.constant 16 : i32
    } else {
    }
    %c0_i32_9 = arith.constant 0 : i32
    %c16_i32 = arith.constant 16 : i32
    %19 = arith.addi %c0_i32_9, %c16_i32 : i32
    %c1_i32_10 = arith.constant 1 : i32
    scf.for %arg10 = %c0_i32_9 to %19 step %c1_i32_10  : i32 {
      %c0_i32_16 = arith.constant 0 : i32
      %c0_i32_17 = arith.constant 0 : i32
      %c0_i32_18 = arith.constant 0 : i32
      %c0_i32_19 = arith.constant 0 : i32
      %28 = tpu.memref_slice %arg4[%c0_i32_16, %c0_i32_19] : memref<512x128xf32, #tpu.memory_space<any>> -> memref<1x128xf32, #tpu.memory_space<any>>
      %29 = tpu.memref_squeeze %28 : memref<1x128xf32, #tpu.memory_space<any>> -> memref<128xf32, #tpu.memory_space<any>>
      %c0_i32_20 = arith.constant 0 : i32
      %30 = tpu.memref_slice %arg7[%11, %c0_i32_17, %c0_i32_20] : memref<2x16x128xf32, #tpu.memory_space<vmem>> -> memref<1x1x128xf32, #tpu.memory_space<vmem>>
      %31 = tpu.memref_squeeze %30 : memref<1x1x128xf32, #tpu.memory_space<vmem>> -> memref<128xf32, #tpu.memory_space<vmem>>
      %32 = tpu.memref_slice %arg9[%c0_i32_18, %11] : memref<2x2x!tpu.dma_semaphore, #tpu.memory_space<semaphore_mem>> -> memref<1x1x!tpu.dma_semaphore, #tpu.memory_space<semaphore_mem>>
      %33 = tpu.memref_squeeze %32 : memref<1x1x!tpu.dma_semaphore, #tpu.memory_space<semaphore_mem>> -> memref<!tpu.dma_semaphore, #tpu.memory_space<semaphore_mem>>
      tpu.wait_dma2 semaphore(%33 : memref<!tpu.dma_semaphore, #tpu.memory_space<semaphore_mem>>) src(%29 : memref<128xf32, #tpu.memory_space<any>>) dst(%31 : memref<128xf32, #tpu.memory_space<vmem>>)
      %c0_i32_21 = arith.constant 0 : i32
      %c0_i32_22 = arith.constant 0 : i32
      %c1_i32_23 = arith.constant 1 : i32
      %c0_i32_24 = arith.constant 0 : i32
      %34 = tpu.memref_slice %arg5[%c0_i32_21, %c0_i32_24] : memref<64x128xf32, #tpu.memory_space<any>> -> memref<1x128xf32, #tpu.memory_space<any>>
      %35 = tpu.memref_squeeze %34 : memref<1x128xf32, #tpu.memory_space<any>> -> memref<128xf32, #tpu.memory_space<any>>
      %c0_i32_25 = arith.constant 0 : i32
      %36 = tpu.memref_slice %arg8[%11, %c0_i32_22, %c0_i32_25] : memref<2x16x128xf32, #tpu.memory_space<vmem>> -> memref<1x1x128xf32, #tpu.memory_space<vmem>>
      %37 = tpu.memref_squeeze %36 : memref<1x1x128xf32, #tpu.memory_space<vmem>> -> memref<128xf32, #tpu.memory_space<vmem>>
      %38 = tpu.memref_slice %arg9[%c1_i32_23, %11] : memref<2x2x!tpu.dma_semaphore, #tpu.memory_space<semaphore_mem>> -> memref<1x1x!tpu.dma_semaphore, #tpu.memory_space<semaphore_mem>>
      %39 = tpu.memref_squeeze %38 : memref<1x1x!tpu.dma_semaphore, #tpu.memory_space<semaphore_mem>> -> memref<!tpu.dma_semaphore, #tpu.memory_space<semaphore_mem>>
      tpu.wait_dma2 semaphore(%39 : memref<!tpu.dma_semaphore, #tpu.memory_space<semaphore_mem>>) src(%35 : memref<128xf32, #tpu.memory_space<any>>) dst(%37 : memref<128xf32, #tpu.memory_space<vmem>>)
    }
    %20 = arith.index_cast %11 : i32 to index
    %c0 = arith.constant 0 : index
    %c0_11 = arith.constant 0 : index
    %21 = vector.load %arg7[%20, %c0, %c0_11] : memref<2x16x128xf32, #tpu.memory_space<vmem>>, vector<1x16x128xf32>
    %22 = vector.shape_cast %21 : vector<1x16x128xf32> to vector<16x128xf32>
    %23 = arith.index_cast %11 : i32 to index
    %c0_12 = arith.constant 0 : index
    %c0_13 = arith.constant 0 : index
    %24 = vector.load %arg8[%23, %c0_12, %c0_13] : memref<2x16x128xf32, #tpu.memory_space<vmem>>, vector<1x16x128xf32>
    %25 = vector.shape_cast %24 : vector<1x16x128xf32> to vector<16x128xf32>
    %26 = arith.addf %22, %25 : vector<16x128xf32>
    %c0_14 = arith.constant 0 : index
    %c0_15 = arith.constant 0 : index
    %27 = vector.load %arg6[%c0_14, %c0_15] : memref<16x128xf32, #tpu.memory_space<vmem>>, vector<16x128xf32>
    tpu.vector_store %arg6[%c0_14, %c0_15], %26 {strides = array<i32>} : memref<16x128xf32, #tpu.memory_space<vmem>>, vector<16x128xf32>,
    return
  }
  func.func @transform_2(%arg0: i32, %arg1: i32, %arg2: memref<16xi32, #tpu.memory_space<smem>>, %arg3: memref<16xi32, #tpu.memory_space<smem>>) -> (i32, i32) {
    %c1_i32 = arith.constant 1 : i32
    %0 = arith.muli %arg0, %c1_i32 : i32
    %1 = arith.addi %0, %arg1 : i32
    %c0_i32 = arith.constant 0 : i32
    %c0_i32_0 = arith.constant 0 : i32
    return %1, %c0_i32 : i32, i32
  }
}

</mosaic_0001>

<bundles_post_ra>
// kernel: tpu_custom_call.1
= control target key start
LH: loop header
LB: loop body
LE: loop exit
PB: predicated region body
PF: predicated region fallthrough
CT: control target
= control target key end

     0   :  { %s377_s15 = smov [#allocation6]   ;;  %s457_s0 = inlined_call_operand.hbm [shape: s32[16], index: 0, kind: input, shape index: {}]   ;;  %s458_s2 = inlined_call_operand.hbm [shape: f32[512,128], index: 2, kind: input, shape index: {}]   ;;  %s459_s3 = inlined_call_operand.hbm [shape: f32[64,128], index: 3, kind: input, shape index: {}]   ;;  %s460_s4 = inlined_call_operand.hbm [shape: f32[16,128], index: 4, kind: output, shape index: {}]   ;;  %s461_s1 = inlined_call_operand.vmem [shape: s32[16], index: 1, kind: input, shape index: {}]  }
   0x1   :  { %10 = dma.hbm_to_smem %s457_s0, 16, %s377_s15, [#allocation5] }
   0x2   :  { %s11_s20 = sshll.u32 %s461_s1, 4  ;;  %s12_s20 = int_to_ptr.vmem [resolvable:$true] %s11_s20 }
   0x3   :  { %s277_s21 = scalar_lea.vmem %s12_s20, 16  ;;  %p282_p1 = scmp.lt.s32.totalorder %s12_s20, %s12_s20 }
   0x4   :  { %p278_p0 = scmp.ne.s32.totalorder %s12_s20, %s277_s21  ;;  %p283_p2 = scmp.lt.s32.totalorder %s277_s21, %s277_s21 }
   0x6   :  { %p284_p3 = por %p283_p2, %p282_p1 }
   0x8   :  { %p285_p4 = pnand %p284_p3, %p278_p0 }
   0xa   :  { %288 = shalt.err (!%p285_p4)  }
   0xb   :  { %s378_s22 = smov [#allocation7]  }
   0xc   :  { %14 = dma.vmem_to_smem %s12_s20, 16, %s378_s22, [#allocation5] }
   0xd   :  { %361 = dma.done.wait [#allocation5], 32 }
   0xe   :  { %362 = vsyncadd [#allocation5], 4294967264 }
   0xf   :  { %16 = sfence }
  0x10   :  { %17 = vsyncpa [#allocation9], 0  ;;  %s415_s23 = smov 0  }
  0x11 LB: > { %s41_s0 = sld [smem:[#allocation6 + %s371_s23]]  ;;  %s45_s24 = scalar_lea.vmem [#allocation2], %s371_s23  ;;  %s371_s23 = sphi %s415_s23, %s39_s23  }
  0x12   : > { %s422_s1 = sld [smem:[#allocation7 + %s371_s23]]  ;;  %s53_s25 = sshll.u32 %s45_s24, 4  ;;  %s54_s25 = int_to_ptr.vmem [resolvable:$true] %s53_s25 }
  0x13   : > { %s59_s26 = scalar_lea.vmem [#allocation3], %s371_s23  ;;  %s291_s10 = scalar_lea.hbm %s458_s2, 8192 }
  0x14   : > { %s68_s27 = sshll.u32 %s59_s26, 4  ;;  %s426_s27 = int_to_ptr.vmem [resolvable:$true] %s68_s27 }
  0x17   : > { %s234_s28 = sshll.u32 %s41_s0, 4 }
  0x18   : > { %s44_s5 = scalar_lea.hbm %s458_s2, %s234_s28  ;;  %s235_s6 = sshll.u32 %s422_s1, 4 }
  0x19   : > { %s289_s7 = scalar_lea.hbm %s44_s5, 16  ;;  %p292_p6 = scmp.lt.s32.totalorder %s44_s5, %s458_s2 }
  0x1a   : > { %p290_p5 = scmp.ne.s32.totalorder %s44_s5, %s289_s7  ;;  %p293_p7 = scmp.lt.s32.totalorder %s291_s10, %s289_s7 }
  0x1c   : > { %p294_p8 = por %p293_p7, %p292_p6 }
  0x1e   : > { %p295_p9 = pnand %p294_p8, %p290_p5 }
  0x20   : > { %298 = shalt.err (!%p295_p9)  }
  0x21   : > { %s299_s13 = scalar_lea.vmem %s54_s25, 16  ;;  %s379_s14 = smov [#allocation2]  }
  0x22   : > { %p300_p10 = scmp.ne.s32.totalorder %s54_s25, %s299_s13  ;;  %s301_s15 = sshll.u32 %s379_s14, 4  ;;  %s302_s15 = int_to_ptr.vmem [resolvable:$false] %s301_s15 }
  0x23   : > { %s303_s16 = scalar_lea.vmem %s302_s15, 512  ;;  %p304_p11 = scmp.lt.s32.totalorder %s54_s25, %s302_s15 }
  0x24   : > { %p305_p12 = scmp.lt.s32.totalorder %s303_s16, %s299_s13 }
  0x26   : > { %p306_p13 = por %p305_p12, %p304_p11 }
  0x28   : > { %p307_p0 = pnand %p306_p13, %p300_p10 }
  0x2a   : > { %310 = shalt.err (!%p307_p0)  }
  0x2b   : > { %56 = dma.hbm_to_vmem [thread:$0]  %s44_s5, 16, %s54_s25, [#allocation4] }
  0x2c   : > { %s58_s19 = scalar_lea.hbm %s459_s3, %s235_s6  ;;  %s313_s0 = scalar_lea.hbm %s459_s3, 1024 }
  0x2d   : > { %s311_s20 = scalar_lea.hbm %s58_s19, 16  ;;  %p314_p2 = scmp.lt.s32.totalorder %s58_s19, %s459_s3 }
  0x2e   : > { %p312_p1 = scmp.ne.s32.totalorder %s58_s19, %s311_s20  ;;  %p315_p3 = scmp.lt.s32.totalorder %s313_s0, %s311_s20 }
  0x30   : > { %p316_p4 = por %p315_p3, %p314_p2 }
  0x32   : > { %p317_p5 = pnand %p316_p4, %p312_p1 }
  0x34   : > { %320 = shalt.err (!%p317_p5)  }
  0x35   : > { %s321_s25 = scalar_lea.vmem %s426_s27, 16  ;;  %s380_s26 = smov [#allocation3]  }
  0x36   : > { %p322_p6 = scmp.ne.s32.totalorder %s426_s27, %s321_s25  ;;  %s323_s28 = sshll.u32 %s380_s26, 4  ;;  %s324_s28 = int_to_ptr.vmem [resolvable:$false] %s323_s28 }
  0x37   : > { %s325_s29 = scalar_lea.vmem %s324_s28, 512  ;;  %p326_p7 = scmp.lt.s32.totalorder %s426_s27, %s324_s28 }
  0x38   : > { %p327_p8 = scmp.lt.s32.totalorder %s325_s29, %s321_s25 }
  0x3a   : > { %p328_p9 = por %p327_p8, %p326_p7 }
  0x3c   : > { %p329_p10 = pnand %p328_p9, %p322_p6 }
  0x3e   : > { %332 = shalt.err (!%p329_p10)  }
  0x3f   : > { %71 = dma.hbm_to_vmem [thread:$0]  %s58_s19, 16, %s426_s27, [#allocation4 + $0x2] }
  0x40   : > { %s39_s23 = sadd.s32 1, %s371_s23  }
  0x41   : > { %p36_p11 = scmp.ge.s32.totalorder %s39_s23, 16  }
  0x42   :  { %s373_s30 = smov (%p36_p11), 0  }
  0x43   :  { %38 = sbr.rel (!%p36_p11) target bundleno = 17 (0x11), region = 84 }
  0x48 LB: > { %363 = dma.done.wait [#allocation4], 16  ;;  %s375_s30 = sphi %s373_s30, %s127_s30  }
  0x49   : > { %364 = vsyncadd [#allocation4], 4294967280 }
  0x4a   : > { %365 = dma.done.wait [#allocation4 + $0x2], 16 }
  0x4b   : > { %366 = vsyncadd [#allocation4 + $0x2], 4294967280  ;;  %s127_s30 = sadd.s32 1, %s375_s30  }
  0x4c   : > { %p124_p12 = scmp.ge.s32.totalorder %s127_s30, 16  }
  0x4d   :  { %v137_v0 = vld [vmem:[#allocation2] sm:$0xff] (%p124_p12)  ;;  %v138_v2 = vld [vmem:[#allocation2 + $0x8] sm:$0xff] (%p124_p12)  ;;  %s381_s27 = smov (%p124_p12), [#allocation8]  }
  0x4e   :  { %126 = sbr.rel (!%p124_p12) target bundleno = 72 (0x48), region = 106  ;;  %v140_v1 = vld [vmem:[#allocation3] sm:$0xff] (%p124_p12)  ;;  %v141_v4 = vld [vmem:[#allocation3 + $0x8] sm:$0xff] (%p124_p12)  ;;  %s155_s23 = sshll.u32 (%p124_p12), %s381_s27, 4  ;;  %s156_s23 = int_to_ptr.vmem [resolvable:$true] %s155_s23 }
  0x4f   :  { %v142_v3 = vadd.f32 (%p124_p12), %v140_v1, %v137_v0  ;;  %v143_v5 = vadd.f32 (%p124_p12), %v141_v4, %v138_v2  ;;  %s333_s2 = scalar_lea.vmem (%p124_p12), %s156_s23, 256  ;;  %p338_p0 = scmp.lt.s32.totalorder (%p124_p12), %s156_s23, %s156_s23 }
  0x50   :  { %p334_p13 = scmp.ne.s32.totalorder (%p124_p12), %s156_s23, %s333_s2  ;;  %p339_p1 = scmp.lt.s32.totalorder (%p124_p12), %s333_s2, %s333_s2 }
  0x51   :  { %144 = vst [vmem:[#allocation8] sm:$0xff] (%p124_p12), %v142_v3  ;;  %145 = vst [vmem:[#allocation8 + $0x8] sm:$0xff] (%p124_p12), %v143_v5 }
  0x52   :  { %p340_p2 = por (%p124_p12), %p339_p1, %p338_p0 }
  0x54   :  { %p341_p3 = pnand %p340_p2, %p334_p13 }
  0x56   :  { %344 = shalt.err (!%p341_p3)
}
  0x57   :  { %s382_s3 = smov 128   ;;  %s383_s5 = smov 8  }
  0x58   :  { %161 = dma.vmem_to_hbm [thread:$0]  %s156_s23, 256, %s460_s4, [#allocation9], %s382_s3, %s382_s3, %s383_s5  }
  0x59   :  { %367 = dma.done.wait [#allocation9], 256  }
  0x5a   :  { %368 = vsyncadd [#allocation9], 4294967040 }
  0x5b   :  { %165 = vsyncpa [#allocation9], 1 }
  0x5c   :  { %166 = vsyncmov [#allocation4] }
  0x5f   :  { %s167_s8 = vpop.sfrf %166 }
  0x60   :  { %p240_p4 = scmp.ne.s32.totalorder %s167_s8, 0 }
  0x62   :  { %171 = shalt.err (%p240_p4)  }
  0x63   :  { %173 = vsyncmov [#allocation4 + $0x1] }
  0x66   :  { %s174_s9 = vpop.sfrf %173 }
  0x67   :  { %p241_p5 = scmp.ne.s32.totalorder %s174_s9, 0 }
  0x69   :  { %178 = shalt.err (%p241_p5)  }
  0x6a   :  { %180 = vsyncmov [#allocation4 + $0x2] }
  0x6d   :  { %s181_s10 = vpop.sfrf %180 }
  0x6e   :  { %p242_p6 = scmp.ne.s32.totalorder %s181_s10, 0 }
  0x70   :  { %185 = shalt.err (%p242_p6)  }
  0x71   :  { %187 = vsyncmov [#allocation4 + $0x3] }
  0x74   :  { %s188_s11 = vpop.sfrf %187 }
  0x75   :  { %p243_p7 = scmp.ne.s32.totalorder %s188_s11, 0 }
  0x77   :  { %192 = shalt.err (%p243_p7)  }

</bundles_post_ra>
